<compile_context>
chip_gen: v7x
topology: tpu7x:2x2x1
jax: 0.10.0
libtpu: 0.0.40
codegen_flags: <defaults>
</compile_context>

<pallas_src>
import math
import functools

import jax
import jax.numpy as jnp
from jax import lax
from jax.experimental import pallas as pl
from jax.experimental.pallas import tpu as pltpu


@functools.lru_cache(maxsize=1)
def _vmem_limit_bytes():
    """Generation-aware scoped-VMEM cap: ~48 MiB on 128 MiB parts (v5e/v6e),
    ~40 MiB on v7x (64 MiB physical)."""
    default = 48 * 1024 * 1024
    try:
        cap = getattr(pltpu.get_tpu_info(), "vmem_capacity_bytes", None)
        if cap:
            return int(min(default, (cap * 5) // 8))
    except Exception:
        pass
    return default


def _pick_tile(dim, target, mult):
    """Largest tile t <= target with t % mult == 0 and dim % t == 0, else the full dim.

    Guarantees the (8, 128) block constraint: the returned tile is either a
    multiple of `mult` or equal to the full dimension.
    """
    if dim <= target:
        return dim
    t = (min(target, dim) // mult) * mult
    while t >= mult:
        if dim % t == 0:
            return t
        t -= mult
    return dim


# ---------------------------------------------------------------------------
# Kernel 1: tiled, pipelined linear layer  y = x @ W + b   (bf16 MXU, f32 acc)
# ---------------------------------------------------------------------------
def _linear_kernel(x_ref, w_ref, b_ref, o_ref, acc_ref):
    k = pl.program_id(2)

    @pl.when(k == 0)
    def _():
        acc_ref[...] = jnp.zeros_like(acc_ref)

    # Weights arrive as bf16; cast the activation tile to bf16 so the MXU runs
    # a single bf16 pass per vmatmul (f32 accumulation kept).
    acc_ref[...] += jnp.dot(
        x_ref[...].astype(jnp.bfloat16), w_ref[...],
        preferred_element_type=jnp.float32)

    @pl.when(k == pl.num_programs(2) - 1)
    def _():
        out = acc_ref[...] + b_ref[...].astype(jnp.float32)  # (1, tn) broadcasts
        o_ref[...] = out.astype(o_ref.dtype)


def linear(x2d, w, b, *, out_dtype=None, tm=512, tn=256, tk=1024):
    """x2d: (M, K), w: (K, N) [bf16], b: (N,) -> (M, N). Tiled + double-buffered."""
    M, K = x2d.shape
    K2, N = w.shape
    assert K == K2 and b.shape == (N,)
    out_dtype = out_dtype or x2d.dtype

    tm = _pick_tile(M, tm, 8)      # second-minor dims: multiple of 8 (or full)
    tn = _pick_tile(N, tn, 128)    # lane dims: multiple of 128 (or full)
    tk = _pick_tile(K, tk, 128)
    grid = (pl.cdiv(M, tm), pl.cdiv(N, tn), pl.cdiv(K, tk))

    b2d = b.reshape(1, N).astype(jnp.float32)
    return pl.pallas_call(
        _linear_kernel,
        out_shape=jax.ShapeDtypeStruct((M, N), out_dtype),
        grid_spec=pltpu.PrefetchScalarGridSpec(
            num_scalar_prefetch=0,
            grid=grid,
            in_specs=[
                pl.BlockSpec((tm, tk), lambda i, j, k: (i, k)),
                pl.BlockSpec((tk, tn), lambda i, j, k: (k, j)),
                pl.BlockSpec((1, tn), lambda i, j, k: (0, j)),
            ],
            out_specs=pl.BlockSpec((tm, tn), lambda i, j, k: (i, j)),
            scratch_shapes=[pltpu.VMEM((tm, tn), jnp.float32)],
        ),
        compiler_params=pltpu.CompilerParams(
            dimension_semantics=("parallel", "parallel", "arbitrary"),
            vmem_limit_bytes=_vmem_limit_bytes(),
        ),
    )(x2d, w, b2d)


# ---------------------------------------------------------------------------
# Kernel 2: flash-style causal attention, all heads per step, (B, T, C) layout
# ---------------------------------------------------------------------------
def _attn_kernel(q_ref, k_ref, v_ref, o_ref, m_sc, l_sc, acc_sc, *,
                 n_head, head_dim, tq, tkv):
    qi = pl.program_id(1)
    ki = pl.program_id(2)

    @pl.when(ki == 0)
    def _():
        m_sc[...] = jnp.full_like(m_sc, -1e30)
        l_sc[...] = jnp.zeros_like(l_sc)
        acc_sc[...] = jnp.zeros_like(acc_sc)

    def process(masked):
        q_blk = q_ref[0]          # (tq,  C) bf16, q already scaled by 1/sqrt(D)
        k_blk = k_ref[0]          # (tkv, C) bf16
        v_blk = v_ref[0]          # (tkv, C) bf16

        m_prev = m_sc[...]        # (tq, n_head) f32 — single load
        l_prev = l_sc[...]        # (tq, n_head)
        acc_prev = acc_sc[...]    # (tq, C)       — single lane-dense load

        if masked:
            # Built once per (q-block, kv-block); only on diagonal-crossing blocks.
            row = qi * tq + lax.broadcasted_iota(jnp.int32, (tq, tkv), 0)
            col = ki * tkv + lax.broadcasted_iota(jnp.int32, (tq, tkv), 1)
            neg_mask = jnp.where(col <= row, jnp.float32(0.0), jnp.float32(-1e30))

        m_cols, l_cols, alpha_cols, pv_cols = [], [], [], []
        for h in range(n_head):
            sl = slice(h * head_dim, (h + 1) * head_dim)
            s = lax.dot_general(                          # (tq, tkv) f32
                q_blk[:, sl], k_blk[:, sl], (((1,), (1,)), ((), ())),
                preferred_element_type=jnp.float32)
            if masked:
                s = s + neg_mask

            m_p = m_prev[:, h:h + 1]                      # (tq, 1)
            m_n = jnp.maximum(m_p, jnp.max(s, axis=-1, keepdims=True))
            alpha = jnp.exp(m_p - m_n)
            p = jnp.exp(s - m_n)                          # (tq, tkv) f32

            m_cols.append(m_n)
            l_cols.append(alpha * l_prev[:, h:h + 1]
                          + jnp.sum(p, axis=-1, keepdims=True))
            alpha_cols.append(jnp.broadcast_to(alpha, (tq, head_dim)))
            pv_cols.append(jnp.dot(p.astype(v_blk.dtype), v_blk[:, sl],
                                   preferred_element_type=jnp.float32))

        # Batched scratch updates: one store each for m/l, one lane-dense acc RMW.
        m_sc[...] = jnp.concatenate(m_cols, axis=-1)
        l_sc[...] = jnp.concatenate(l_cols, axis=-1)
        acc_sc[...] = (jnp.concatenate(alpha_cols, axis=-1) * acc_prev
                       + jnp.concatenate(pv_cols, axis=-1))

    # Block-level causal classification.
    contributes = ki * tkv <= qi * tq + (tq - 1)                 # any visible key
    fully_visible = ki * tkv + (tkv - 1) <= qi * tq              # no masking needed

    @pl.when(jnp.logical_and(contributes, fully_visible))
    def _():
        process(masked=False)

    @pl.when(jnp.logical_and(contributes, jnp.logical_not(fully_visible)))
    def _():
        process(masked=True)

    @pl.when(ki == pl.num_programs(2) - 1)
    def _():
        inv = pl.reciprocal(l_sc[...], approx=True)              # (tq, n_head), EUP
        inv_full = jnp.concatenate(
            [jnp.broadcast_to(inv[:, h:h + 1], (tq, head_dim))
             for h in range(n_head)], axis=-1)                   # (tq, C)
        # Single lane-dense (tq, C) store.
        o_ref[0] = (acc_sc[...] * inv_full).astype(o_ref.dtype)


def _flash_attention(q_arr, k_arr, v_arr, q_off, k_off, v_off, *,
                     B, T, C, n_head, out_dtype, tq=256, tkv=256):
    """q/k/v arrays are (B, T, C) or one fused (B, T, 3C) qkv tensor (bf16);
    q_off/k_off/v_off are block indices (in units of C) along the last axis."""
    D = C // n_head
    tq = _pick_tile(T, tq, 8)
    tkv = _pick_tile(T, tkv, 8)
    grid = (B, pl.cdiv(T, tq), pl.cdiv(T, tkv))

    kernel = functools.partial(_attn_kernel, n_head=n_head, head_dim=D,
                               tq=tq, tkv=tkv)

    # Causal DMA skip: for steps above the diagonal, return the same kv block
    # index as the last useful step so no new K/V copy is issued.  The compute
    # skip stays in the kernel (pl.when), so kv blocks are still processed in
    # ascending order starting at ki=0 (keeps the -1e30-init invariant).
    def kv_block(qi, ki):
        return jnp.minimum(ki, (qi * tq + (tq - 1)) // tkv)

    q_spec = pl.BlockSpec((1, tq, C), lambda b, qi, ki: (b, qi, q_off))
    k_spec = pl.BlockSpec((1, tkv, C), lambda b, qi, ki: (b, kv_block(qi, ki), k_off))
    v_spec = pl.BlockSpec((1, tkv, C), lambda b, qi, ki: (b, kv_block(qi, ki), v_off))
    o_spec = pl.BlockSpec((1, tq, C), lambda b, qi, ki: (b, qi, 0))

    return pl.pallas_call(
        kernel,
        out_shape=jax.ShapeDtypeStruct((B, T, C), out_dtype),
        grid_spec=pltpu.PrefetchScalarGridSpec(
            num_scalar_prefetch=0,
            grid=grid,
            in_specs=[q_spec, k_spec, v_spec],
            out_specs=o_spec,
            scratch_shapes=[
                pltpu.VMEM((tq, n_head), jnp.float32),   # running max  m
                pltpu.VMEM((tq, n_head), jnp.float32),   # running sum  l
                pltpu.VMEM((tq, C), jnp.float32),        # output accumulator
            ],
        ),
        compiler_params=pltpu.CompilerParams(
            dimension_semantics=("parallel", "parallel", "arbitrary"),
            vmem_limit_bytes=_vmem_limit_bytes(),
        ),
    )(q_arr, k_arr, v_arr)


# ---------------------------------------------------------------------------
# Module wrapper — mirrors CausalSelfAttention.forward
# ---------------------------------------------------------------------------
def causal_self_attention(x, params, n_head):
    """x: (B, T, C). Same math as the PyTorch module (bf16 MXU, f32 accumulation)."""
    B, T, C = x.shape
    assert C % n_head == 0
    D = C // n_head
    scale = 1.0 / math.sqrt(D)
    out_dtype = x.dtype

    # Fold 1/sqrt(D) into the q columns of c_attn (fuses with the bf16 cast of
    # the weights); cast both weight matrices to bf16 to halve weight DMA bytes
    # and get full-rate bf16 MXU passes.
    col_scale = jnp.concatenate(
        [jnp.full((C,), scale, jnp.float32), jnp.ones((2 * C,), jnp.float32)])
    w_attn = (params["w_attn"] * col_scale[None, :]).astype(jnp.bfloat16)
    b_attn = params["b_attn"] * col_scale
    w_proj = params["w_proj"].astype(jnp.bfloat16)
    b_proj = params["b_proj"]

    # c_attn: Linear(C, 3C) — qkv emitted in bf16 (halves the (B,T,3C) HBM
    # write and every q/k/v block read in the attention kernel).
    qkv = linear(x.reshape(B * T, C), w_attn, b_attn, out_dtype=jnp.bfloat16)
    qkv = qkv.reshape(B, T, 3 * C)

    if C % 128 == 0:
        # Fused path: q/k/v (and the per-head split) are read directly out of
        # the (B, T, 3C) qkv tensor via BlockSpec block indices 0/1/2 — no
        # jnp.split and no (B,T,H,D) transposes touch HBM.
        y = _flash_attention(qkv, qkv, qkv, 0, 1, 2,
                             B=B, T=T, C=C, n_head=n_head,
                             out_dtype=jnp.bfloat16)
    else:
        # Fallback for tiny C (< 128 lanes): split once in the wrapper; the
        # kernel still works in (B, T, C) layout with a lane-dense output.
        q, k, v = jnp.split(qkv, 3, axis=-1)
        y = _flash_attention(q, k, v, 0, 0, 0,
                             B=B, T=T, C=C, n_head=n_head,
                             out_dtype=jnp.bfloat16)

    # c_proj: Linear(C, C) — final output back in x's dtype.
    out = linear(y.reshape(B * T, C), w_proj, b_proj, out_dtype=out_dtype)
    return out.reshape(B, T, C)


def init_params(key, n_embd):
    """Deterministic synthetic parameters (PyTorch Linear weights stored as (in, out))."""
    k1, k2, k3, k4 = jax.random.split(key, 4)
    std = 0.02
    return {
        "w_attn": jax.random.normal(k1, (n_embd, 3 * n_embd), jnp.float32) * std,
        "b_attn": jax.random.normal(k2, (3 * n_embd,), jnp.float32) * std,
        "w_proj": jax.random.normal(k3, (n_embd, n_embd), jnp.float32) * std,
        "b_proj": jax.random.normal(k4, (n_embd,), jnp.float32) * std,
    }


# ---------------------------------------------------------------------------
# Reference (pure JAX, f32) for sanity check
# ---------------------------------------------------------------------------
def reference(x, params, n_head):
    B, T, C = x.shape
    D = C // n_head
    qkv = x @ params["w_attn"] + params["b_attn"]
    q, k, v = jnp.split(qkv, 3, axis=2)
    q = q.reshape(B, T, n_head, D).transpose(0, 2, 1, 3)
    k = k.reshape(B, T, n_head, D).transpose(0, 2, 1, 3)
    v = v.reshape(B, T, n_head, D).transpose(0, 2, 1, 3)
    s = jnp.einsum("bhqd,bhkd->bhqk", q, k) / math.sqrt(D)
    mask = jnp.tril(jnp.ones((T, T), bool))
    s = jnp.where(mask[None, None], s, -1e30)
    p = jax.nn.softmax(s, axis=-1)
    y = jnp.einsum("bhqk,bhkd->bhqd", p, v)
    y = y.transpose(0, 2, 1, 3).reshape(B, T, C)
    return y @ params["w_proj"] + params["b_proj"]


if __name__ == "__main__":
    def run_case(B, T, C, H, key):
        kx, kp = jax.random.split(key)
        x = jax.random.normal(kx, (B, T, C), jnp.float32)
        params = init_params(kp, C)
        out = jax.block_until_ready(causal_self_attention(x, params, H))
        ref = reference(x, params, H)
        assert out.shape == (B, T, C)
        # bf16 weights + bf16 qkv intermediates (f32 accumulation) + approx
        # reciprocal vs a pure-f32 reference.
        err = jnp.max(jnp.abs(out - ref))
        assert jnp.allclose(out, ref, atol=1e-2, rtol=5e-2), (
            f"mismatch vs reference: max abs err = {err}")

    key = jax.random.PRNGKey(0)
    k1, k2, k3 = jax.random.split(key, 3)
    run_case(2, 8, 128, 4, k1)    # fused-qkv path, single kv block
    run_case(2, 8, 32, 4, k2)     # fallback path for tiny C (< 128 lanes)
    run_case(2, 512, 128, 4, k3)  # multi-block: causal DMA skip + fully-visible fast path
    print("KERNEL_OK")
</pallas_src>

<mosaic_0001>
module attributes {stable_mosaic.version = 11 : i64} {
  func.func @_linear_kernel(%arg0: i32, %arg1: i32, %arg2: i32, %arg3: memref<16x128xf32, #tpu.memory_space<vmem>>, %arg4: memref<128x128xbf16, #tpu.memory_space<vmem>>, %arg5: memref<1x128xf32, #tpu.memory_space<vmem>>, %arg6: memref<16x128xbf16, #tpu.memory_space<vmem>>, %arg7: memref<16x128xf32, #tpu.memory_space<vmem>>) attributes {dimension_semantics = [#tpu.dimension_semantics<parallel>, #tpu.dimension_semantics<parallel>, #tpu.dimension_semantics<arbitrary>], iteration_bounds = array<i64: 1, 3, 1>, scalar_prefetch = 0 : i64, scratch_operands = 1 : i64, tpu.core_type = #tpu.core_type<tc>, window_params = [{transform_indices = @transform_0, window_bounds = array<i64: 16, 128>}, {transform_indices = @transform_1, window_bounds = array<i64: 128, 128>}, {transform_indices = @transform_2, window_bounds = array<i64: 1, 128>}, {transform_indices = @transform_3, window_bounds = array<i64: 16, 128>}]} {
    %c0_i32 = arith.constant 0 : i32
    %0 = arith.cmpi eq, %arg2, %c0_i32 : i32
    %1 = arith.extui %0 : i1 to i32
    %c0_i32_0 = arith.constant 0 : i32
    %2 = arith.cmpi ne, %1, %c0_i32_0 : i32
    scf.if %2 {
      %cst_10 = arith.constant 0.000000e+00 : f32
      %13 = vector.broadcast %cst_10 : f32 to vector<16x128xf32>
      %c0_11 = arith.constant 0 : index
      %c0_12 = arith.constant 0 : index
      %14 = vector.load %arg7[%c0_11, %c0_12] : memref<16x128xf32, #tpu.memory_space<vmem>>, vector<16x128xf32>
      tpu.vector_store %arg7[%c0_11, %c0_12], %13 {strides = array<i32>} : memref<16x128xf32, #tpu.memory_space<vmem>>, vector<16x128xf32>,
    } else {
    }
    %c0 = arith.constant 0 : index
    %c0_1 = arith.constant 0 : index
    %3 = vector.load %arg7[%c0, %c0_1] : memref<16x128xf32, #tpu.memory_space<vmem>>, vector<16x128xf32>
    %c0_2 = arith.constant 0 : index
    %c0_3 = arith.constant 0 : index
    %4 = vector.load %arg3[%c0_2, %c0_3] : memref<16x128xf32, #tpu.memory_space<vmem>>, vector<16x128xf32>
    %5 = arith.truncf %4 : vector<16x128xf32> to vector<16x128xbf16>
    %c0_4 = arith.constant 0 : index
    %c0_5 = arith.constant 0 : index
    %6 = vector.load %arg4[%c0_4, %c0_5] : memref<128x128xbf16, #tpu.memory_space<vmem>>, vector<128x128xbf16>
    %cst = arith.constant dense<0.000000e+00> : vector<16x128xf32>
    %7 = tpu.matmul %5, %6, %cst {dimension_numbers = #tpu.dot_dimension_numbers<[1], [0], [0], [1], [0, 0, 1, 1], [], []>} : vector<16x128xbf16>, vector<128x128xbf16>, vector<16x128xf32> -> vector<16x128xf32>
    %8 = arith.addf %3, %7 : vector<16x128xf32>
    %c0_6 = arith.constant 0 : index
    %c0_7 = arith.constant 0 : index
    %9 = vector.load %arg7[%c0_6, %c0_7] : memref<16x128xf32, #tpu.memory_space<vmem>>, vector<16x128xf32>
    tpu.vector_store %arg7[%c0_6, %c0_7], %8 {strides = array<i32>} : memref<16x128xf32, #tpu.memory_space<vmem>>, vector<16x128xf32>,
    %c0_i32_8 = arith.constant 0 : i32
    %10 = arith.cmpi eq, %arg2, %c0_i32_8 : i32
    %11 = arith.extui %10 : i1 to i32
    %c0_i32_9 = arith.constant 0 : i32
    %12 = arith.cmpi ne, %11, %c0_i32_9 : i32
    scf.if %12 {
      %c0_10 = arith.constant 0 : index
      %c0_11 = arith.constant 0 : index
      %13 = vector.load %arg7[%c0_10, %c0_11] : memref<16x128xf32, #tpu.memory_space<vmem>>, vector<16x128xf32>
      %c0_12 = arith.constant 0 : index
      %c0_13 = arith.constant 0 : index
      %14 = vector.load %arg5[%c0_12, %c0_13] : memref<1x128xf32, #tpu.memory_space<vmem>>, vector<1x128xf32>
      %15 = vector.broadcast %14 : vector<1x128xf32> to vector<16x128xf32>
      %16 = arith.addf %13, %15 : vector<16x128xf32>
      %17 = arith.truncf %16 : vector<16x128xf32> to vector<16x128xbf16>
      %c0_14 = arith.constant 0 : index
      %c0_15 = arith.constant 0 : index
      %18 = vector.load %arg6[%c0_14, %c0_15] : memref<16x128xbf16, #tpu.memory_space<vmem>>, vector<16x128xbf16>
      tpu.vector_store %arg6[%c0_14, %c0_15], %17 {strides = array<i32>} : memref<16x128xbf16, #tpu.memory_space<vmem>>, vector<16x128xbf16>,
    } else {
    }
    return
  }
  func.func @transform_0(%arg0: i32, %arg1: i32, %arg2: i32) -> (i32, i32) {
    %c0_i32 = arith.constant 0 : i32
    return %arg0, %arg2 : i32, i32
  }
  func.func @transform_1(%arg0: i32, %arg1: i32, %arg2: i32) -> (i32, i32) {
    %c0_i32 = arith.constant 0 : i32
    return %arg2, %arg1 : i32, i32
  }
  func.func @transform_2(%arg0: i32, %arg1: i32, %arg2: i32) -> (i32, i32) {
    %c0_i32 = arith.constant 0 : i32
    %c0_i32_0 = arith.constant 0 : i32
    return %c0_i32, %arg1 : i32, i32
  }
  func.func @transform_3(%arg0: i32, %arg1: i32, %arg2: i32) -> (i32, i32) {
    %c0_i32 = arith.constant 0 : i32
    return %arg0, %arg1 : i32, i32
  }
}

</mosaic_0001>

<bundles_post_ra>
// kernel: tpu_custom_call.1
= control target key start
LH: loop header
LB: loop body
LE: loop exit
PB: predicated region body
PF: predicated region fallthrough
CT: control target
= control target key end

     0   :  { %8 = vsyncpa [#allocation4], 0  ;;  %s1080_s0 = inlined_call_operand.hbm [shape: f32[16,128], index: 0, kind: input, shape index: {}]   ;;  %s1081_s1 = inlined_call_operand.hbm [shape: bf16[128,384], index: 1, kind: input, shape index: {}]   ;;  %s1082_s2 = inlined_call_operand.vmem [shape: f32[1,384], index: 2, kind: input, shape index: {}]   ;;  %s1083_s3 = inlined_call_operand.hbm [shape: bf16[16,384], index: 3, kind: output, shape index: {}]  }
   0x1   :  { %9 = vsyncpa [#allocation7], 0 }
   0x2   :  { %11 = vsyncpa [#allocation7 + $0x1], 0 }
   0x3   :  { %12 = vsyncpa [#allocation5], 0 }
   0x4   :  { %14 = vsyncpa [#allocation5 + $0x1], 0  ;;  %s863_s12 = smov 0   ;;  %s865_s13 = smov 0  }
   0x5   :  { %s867_s14 = smov 0   ;;  %s869_s15 = smov 0  }
   0x6   :  { %s871_s16 = smov 0   ;;  %s873_s17 = smov 0  }
   0x7 LB: > { %s531_s18 = sadd.s32 4294967295, %s828_s17   ;;  %s532_s19 = sadd.s32 4294967294, %s828_s17   ;;  %s828_s17 = sphi %s873_s17, %s20_s17   ;;  %s824_s16 = sphi %s871_s16, %s1108_s16   ;;  %s820_s15 = sphi %s869_s15, %s1107_s15   ;;  %s816_s14 = sphi %s867_s14, %s1106_s14   ;;  %s812_s13 = sphi %s865_s13, %s1105_s13   ;;  %s808_s12 = sphi %s863_s12, %s1104_s12  }
   0x8   : > { %p83_p0 = scmp.ne.s32.totalorder %s816_s14, %s812_s13  ;;  %p84_p1 = scmp.eq.s32.totalorder %s828_s17, 0 }
   0x9   : > { %p89_p2 = scmp.ne.s32.totalorder %s812_s13, %s808_s12  ;;  %p900_p3 = scmp.eq.s32.totalorder %s531_s18, 0 }
   0xa   : > { %p904_p4 = por %p84_p1, %p83_p0  ;;  %p141_p5 = scmp.eq.s32.totalorder %s531_s18, 2 }
   0xb   : > { %s1090_s20 = scalar_select %p900_p3, 1, 0 }
   0xc   : > { %p910_p6 = por %p900_p3, %p89_p2  ;;  %p147_p7 = scmp.eq.s32.totalorder %s532_s19, 2 }
   0xd   : > { %p914_p8 = por %p141_p5, %p83_p0  ;;  %p533_p9 = scmp.ge.s32.totalorder %s828_s17, 1 }
   0xe   : > { %s1092_s22 = scalar_select %p910_p6, 1, 0 }
   0xf   : > { %s1093_s23 = scalar_select %p914_p8, 1, 0 }
  0x10   : > { %p919_p10 = por %p147_p7, %p89_p2  ;;  %p154_p11 = scmp.lt.s32.totalorder %s828_s17, 4 }
  0x11   : > { %s830_s26 = smov [#allocation3]   ;;  %p614_p0 = scmp.lt.s32.totalorder %s828_s17, 3 }
  0x12   : > { %s1094_s24 = scalar_select %p919_p10, 1, 0 }
  0x13   : > { %p924_p12 = pnand %p533_p9, %p154_p11  ;;  %s170_s27 = sshll.u32 %s830_s26, 4  ;;  %s171_s27 = int_to_ptr.vmem [resolvable:$true] %s170_s27 }
  0x14   : > { %p939_p2 = pnand %p614_p0, %p904_p4  ;;  %s35_s30 = sadd.s32 1, %s824_s16 }
  0x15   : > { %s1095_s25 = scalar_select %p924_p12, 1, 0 }
  0x16   : > { %p601_p13 = pneg %p924_p12  ;;  %s684_s6 = scalar_lea.hbm %s1080_s0, 256 }
  0x17   : > { %s1097_s29 = scalar_select %p939_p2, 1, 0 }
  0x18   : > { %p933_p1 = pnand %p601_p13, %p900_p3  ;;  %p685_p5 = scmp.ne.s32.totalorder %s1080_s0, %s684_s6 }
  0x19   : > { %p691_p4 = scmp.lt.u32.totalorder %s684_s6, %s1080_s0 }
  0x1a   : > { %p686_p7 = pneg %p933_p1 }
  0x1c   : > { %p687_p9 = pnand %p686_p7, %p685_p5 }
  0x1e   : > { %p688_p11 = pneg %p687_p9 }
  0x20   : > { %p693_p13 = pnand %p691_p4, %p688_p11 }
  0x22   : > { %696 = shalt.err (!%p693_p13)
}
  0x23   : > { %s697_s11 = scalar_lea.vmem %s171_s27, 256  ;;  %p705_p6 = scmp.lt.s32.totalorder %s171_s27, %s171_s27 }
  0x24   : > { %p698_p0 = scmp.ne.s32.totalorder %s171_s27, %s697_s11  ;;  %p706_p3 = scmp.lt.s32.totalorder %s697_s11, %s697_s11 }
  0x26   : > { %p700_p10 = pnand %p698_p0, %p686_p7  ;;  %p707_p12 = por %p706_p3, %p705_p6 }
  0x28   : > { %p701_p8 = pneg %p700_p10 }
  0x2a   : > { %p708_p2 = pnand %p707_p12, %p701_p8 }
  0x2c   : > { %711 = shalt.err (!%p708_p2)
}
  0x2d   : > { %s831_s18 = smov 128   ;;  %s832_s19 = smov 8  }
  0x2e   : > { %604 = dma.hbm_to_vmem [thread:$0]  (!%p933_p1), %s1080_s0, 256, %s171_s27, [#allocation4], %s831_s18, %s831_s18, %s832_s19  }
  0x2f   : > { %p37_p5 = scmp.ge.s32.totalorder %s35_s30, 3  ;;  %s76_s4 = sadd.s32 1, %s816_s14 }
  0x30   : > { %s184_s5 = sand.u32 1, %s816_s14   ;;  %s537_s8 = sshll.u32 %s824_s16, 6 }
  0x31   : > { %s1110_s30 = smov (%p37_p5, %s35_s30), 0  ;;  %s536_s6 = sshll.u32 %s184_s5, 6 }
  0x32   : > { %s72_s7 = ssub.s32 %s824_s16, %s1110_s30  ;;  %s970_s28 = scalar_lea.hbm %s1081_s1, %s537_s8 }
  0x33   : > { %p74_p3 = scmp.eq.s32.totalorder %s72_s7, 0  ;;  %s188_s27 = scalar_lea.vmem [#allocation6], %s536_s6 }
  0x34   : > { %s197_s11 = sshll.u32 %s188_s27, 4  ;;  %s977_s19 = scalar_lea.sflag [#allocation7], %s184_s5  ;;  %s975_s11 = int_to_ptr.vmem [resolvable:$true] %s197_s11 }
  0x35   : > { %s973_s18 = scalar_select %p74_p3, %s816_s14, %s76_s4  }
  0x36   : > { %s712_s21 = scalar_lea.hbm %s970_s28, 1024  ;;  %p1098_p8 = scmp.ne.s32.totalorder %s1097_s29, 0 }
  0x37   : > { %p713_p6 = scmp.ne.s32.totalorder %s970_s28, %s712_s21  ;;  %s717_s8 = scalar_lea.hbm %s1081_s1, 3072 }
  0x38   : > { %p714_p10 = pneg %p1098_p8  ;;  %p718_p2 = scmp.lt.u32.totalorder %s970_s28, %s1081_s1 }
  0x39   : > { %p719_p7 = scmp.lt.u32.totalorder %s717_s8, %s712_s21  ;;  %p721_p11 = scmp.lt.u32.totalorder %s712_s21, %s970_s28 }
  0x3a   : > { %p715_p12 = pnand %p714_p10, %p713_p6 }
  0x3b   : > { %p720_p9 = por %p719_p7, %p718_p2 }
  0x3c   : > { %p716_p1 = pneg %p715_p12 }
  0x3d   : > { %p722_p4 = por %p721_p11, %p720_p9 }
  0x3f   : > { %p723_p13 = pnand %p722_p4, %p716_p1 }
  0x41   : > { %726 = shalt.err (!%p723_p13)
}
  0x42   : > { %s727_s4 = scalar_lea.vmem %s975_s11, 1024  ;;  %s833_s5 = smov [#allocation6]  }
  0x43   : > { %p728_p0 = scmp.ne.s32.totalorder %s975_s11, %s727_s4  ;;  %s732_s10 = sshll.u32 %s833_s5, 4  ;;  %s733_s10 = int_to_ptr.vmem [resolvable:$false] %s732_s10 }
  0x44   : > { %s734_s27 = scalar_lea.vmem %s733_s10, 2048  ;;  %p735_p6 = scmp.lt.s32.totalorder %s975_s11, %s733_s10 }
  0x45   : > { %p730_p5 = pnand %p728_p0, %p714_p10  ;;  %p736_p12 = scmp.lt.s32.totalorder %s734_s27, %s727_s4 }
  0x47   : > { %p731_p3 = pneg %p730_p5  ;;  %p737_p2 = por %p736_p12, %p735_p6 }
  0x49   : > { %p738_p7 = pnand %p737_p2, %p731_p3 }
  0x4b   : > { %741 = shalt.err (!%p738_p7)
}
  0x4c   : > { %s834_s21 = smov 192   ;;  %s835_s26 = smov 64  }
  0x4d   : > { %s836_s7 = smov 4   ;;  %p1099_p10 = scmp.ne.s32.totalorder %s1095_s25, 0 }
  0x4e   : > { %608 = dma.hbm_to_vmem [thread:$0]  (!%p1098_p8), %s970_s28, 1024, %s975_s11, %s977_s19, %s834_s21, %s835_s26, %s836_s7  }
  0x4f   : > { %215 = sbr.rel (%p1099_p10) target bundleno = 358 (0x166), region = 32  ;;  %p1100_p1 = scmp.ne.s32.totalorder (!%p1099_p10), %s1090_s20, 0 }
  0x56   : > { %795 = dma.done.wait (%p1100_p1), [#allocation4], 256  }
  0x57   : > { %797 = vsyncadd (%p1100_p1), [#allocation4], 4294967040  ;;  %s1012_s8 = sand.u32 1, %s812_s13   ;;  %p1101_p9 = scmp.ne.s32.totalorder %s1092_s22, 0 }
  0x58   : > { %s540_s6 = sshll.u32 %s1012_s8, 6  ;;  %s222_s9 = scalar_lea.sflag [#allocation7], %s1012_s8 }
  0x59   : > { %s225_s4 = scalar_lea.vmem [#allocation6], %s540_s6 }
  0x5a   : > { %799 = dma.done.wait (%p1101_p9), %s222_s9, 1024  }
  0x5b   : > { %801 = vsyncadd (%p1101_p9), %s222_s9, 4294966272  ;;  %v837_v0 = vmov 0.0   ;;  %vm838_vm0 = vmmov 0   ;;  %v676_v1 = vld [vmem:[%s225_s4] sm:$0xff]   ;;  %v677_v2 = vld [vmem:[%s225_s4 + $0x8] sm:$0xff]   ;;  %p253_p8 = scmp.lt.s32.totalorder %s820_s15, 2 }
  0x5c   : > { %573 = vmatprep.subr.bf16.mxu0 %v837_v0  ;;  %589 = vmatprep.mubr.msk.bf16.mxu0 %vm838_vm0, %v837_v0  ;;  %v678_v3 = vld [vmem:[%s225_s4 + $0x10] sm:$0xff]   ;;  %v679_v4 = vld [vmem:[%s225_s4 + $0x18] sm:$0xff]   ;;  %v680_v5 = vld [vmem:[%s225_s4 + $0x20] sm:$0xff]   ;;  %s541_s22 = sshll.u32 %s1012_s8, 3  ;;  %s554_s5 = sshll.u32 %s820_s15, 6 }
  0x5d   : > { %574 = vmatpush3.bf16.msra.mxu0 %v676_v1  ;;  %v681_v6 = vld [vmem:[%s225_s4 + $0x28] sm:$0xff]   ;;  %v682_v7 = vld [vmem:[%s225_s4 + $0x30] sm:$0xff]   ;;  %v683_v8 = vld [vmem:[%s225_s4 + $0x38] sm:$0xff]   ;;  %s254_s20 = scalar_select %p253_p8, %s820_s15, 2 }
  0x5e   : > { %575 = vmatprep.subr.bf16.mxu0 %v837_v0  ;;  %v266_v9 = vld [vmem:[#allocation3] sm:$0xff]  ;;  %v267_v10 = vld [vmem:[#allocation3 + $0x8] sm:$0xff]  ;;  %s250_s11 = scalar_lea.vmem [#allocation8], %s541_s22  ;;  %s1032_s21 = scalar_lea.hbm %s1083_s3, %s554_s5 }
  0x5f   : > { %v268_v11 = vpack.c.bf16 %v267_v10, %v266_v9  ;;  %s255_s28 = scalar_lea.vmem %s1082_s2, %s254_s20  ;;  %s418_s19 = sshll.u32 %s250_s11, 4  ;;  %s1027_s19 = int_to_ptr.vmem [resolvable:$true] %s418_s19 }
  0x60   : > { %v550_v13 = vld [vmem:[%s255_s28] ss:$0 sm:$0xff]  ;;  %s403_s26 = scalar_lea.sflag [#allocation5], %s1012_s8  ;;  %s742_s7 = scalar_lea.vmem %s1027_s19, 128 }
  0x61   : > { %576 = vmatpush3.bf16.msra.mxu0 %v677_v2  ;;  %p743_p11 = scmp.ne.s32.totalorder %s1027_s19, %s742_s7  ;;  %p1102_p4 = scmp.ne.s32.totalorder %s1093_s23, 0 }
  0x62   : > { %577 = vmatprep.subr.bf16.mxu0 %v837_v0  ;;  %s839_s15 = smov [#allocation8]  }
  0x63   : > { %p744_p13 = pnand %p743_p11, %p1102_p4  ;;  %s746_s6 = sshll.u32 %s839_s15, 4  ;;  %s747_s6 = int_to_ptr.vmem [resolvable:$false] %s746_s6 }
  0x64   : > { %s748_s9 = scalar_lea.vmem %s747_s6, 256  ;;  %p749_p5 = scmp.lt.s32.totalorder %s1027_s19, %s747_s6 }
  0x65   : > { %578 = vmatpush3.bf16.msra.mxu0 %v678_v3  ;;  %p745_p0 = pneg %p744_p13  ;;  %p750_p3 = scmp.lt.s32.totalorder %s748_s9, %s742_s7 }
  0x66   : > { %579 = vmatprep.subr.bf16.mxu0 %v837_v0 }
  0x67   : > { %p751_p6 = por %p750_p3, %p749_p5 }
  0x69   : > { %580 = vmatpush3.bf16.msra.mxu0 %v679_v4  ;;  %p752_p12 = pnand %p751_p6, %p745_p0 }
  0x6a   : > { %581 = vmatprep.subr.bf16.mxu0 %v837_v0 }
  0x6d   : > { %582 = vmatpush3.bf16.msra.mxu0 %v680_v5 }
  0x6e   : > { %583 = vmatprep.subr.bf16.mxu0 %v837_v0 }
  0x71   : > { %584 = vmatpush3.bf16.msra.mxu0 %v681_v6 }
  0x72   : > { %585 = vmatprep.subr.bf16.mxu0 %v837_v0 }
  0x75   : > { %586 = vmatpush3.bf16.msra.mxu0 %v682_v7 }
  0x76   : > { %587 = vmatprep.subr.bf16.mxu0 %v837_v0 }
  0x79   : > { %588 = vmatpush3.bf16.msra.mxu0 %v683_v8 }
  0x7c   : > { %590 = vmatmul.mubr.bf16.vlgmr.msra.gmra.mrb[0].mxu0 %v268_v11 }
 0x14f   : > { %v367_v12 = vpop.f32.mrb[0].mxu0 }
 0x150   : > { %v591_v14 = vpop.f32.mrb[1].mxu0  ;;  %v390_v16 = vadd.f32 %v550_v13, %v367_v12 }
 0x151   : > { %v370_v15 = vpop.f32.mrb[2].mxu0 }
 0x152   : > { %v391_v17 = vadd.f32 %v550_v13, %v370_v15  ;;  %v592_v18 = vpop.f32.mrb[3].mxu0 }
 0x154   : > { %v562_v19 = vpack.c.bf16 %v391_v17, %v390_v16 }
 0x156   : > { %563 = vst [vmem:[%s250_s11] sm:$0xff] %v562_v19  }
 0x157   : > { %755 = shalt.err (!%p752_p12)
}
 0x158   : > { %s756_s4 = scalar_lea.hbm %s1032_s21, 128  ;;  %s760_s25 = scalar_lea.hbm %s1083_s3, 384 }
 0x159   : > { %p757_p2 = scmp.ne.s32.totalorder %s1032_s21, %s756_s4  ;;  %p761_p1 = scmp.lt.u32.totalorder %s1032_s21, %s1083_s3 }
 0x15a   : > { %p762_p9 = scmp.lt.u32.totalorder %s760_s25, %s756_s4  ;;  %p764_p11 = scmp.lt.u32.totalorder %s756_s4, %s1032_s21 }
 0x15b   : > { %p758_p7 = pnand %p757_p2, %p1102_p4 }
 0x15c   : > { %p763_p8 = por %p762_p9, %p761_p1 }
 0x15d   : > { %p759_p10 = pneg %p758_p7 }
 0x15e   : > { %p765_p13 = por %p764_p11, %p763_p8 }
 0x160   : > { %p766_p0 = pnand %p765_p13, %p759_p10 }
 0x162   : > { %769 = shalt.err (!%p766_p0)
}
 0x163   : > { %s840_s11 = smov 64   ;;  %s841_s5 = smov 192  }
 0x164   : > { %s842_s10 = smov 4  }
 0x165   : > { %599 = dma.vmem_to_hbm [thread:$0]  (%p1102_p4), %s1027_s19, 128, %s1032_s21, %s403_s26, %s840_s11, %s841_s5, %s842_s10  }
 0x166 PF: > { %p616_p5 = scmp.ge.s32.totalorder %s828_s17, 2  ;;  %s433_s27 = sand.u32 1, %s808_s12  }
 0x167   : > { %p1103_p3 = scmp.ne.s32.totalorder %s1094_s24, 0  ;;  %s434_s7 = scalar_lea.sflag [#allocation5], %s433_s27 }
 0x169   : > { %p610_p6 = pnand %p616_p5, %p1103_p3 }
 0x16b   : > { %803 = dma.done.wait (!%p610_p6), %s434_s7, 128  }
 0x16c   : > { %805 = vsyncadd (!%p610_p6), %s434_s7, 4294967168  ;;  %s20_s17 = sadd.s32 1, %s828_s17   ;;  %s1104_s12 = smov %s812_s13 }
 0x16d   : > { %p17_p12 = scmp.ge.s32.totalorder %s20_s17, 5   ;;  %s1105_s13 = smov %s816_s14 }
 0x16e   : > { %s1106_s14 = smov %s973_s18  ;;  %s1107_s15 = smov %s824_s16 }
 0x16f   : > { %s1108_s16 = smov %s1110_s30  ;;  %19 = sbr.rel (!%p17_p12) target bundleno = 7 (0x7), region = 94 }
 0x176   :  { %439 = vsyncpa [#allocation4], 1 }
 0x177   :  { %441 = vsyncpa [#allocation4 + $0x1], 1 }
 0x178   :  { %442 = vsyncpa [#allocation7], 1 }
 0x179   :  { %444 = vsyncpa [#allocation7 + $0x1], 1 }
 0x17a   :  { %445 = vsyncpa [#allocation5], 1 }
 0x17b   :  { %447 = vsyncpa [#allocation5 + $0x1], 1 }

</bundles_post_ra>
